<compile_context>
chip_gen: v6e
topology: v6e:2x2x1
jax: 0.10.0
libtpu: 0.0.40
codegen_flags: <defaults>
</compile_context>

<pallas_src>
import jax
import jax.numpy as jnp
from jax import lax
from jax.experimental import pallas as pl
from jax.experimental.pallas import tpu as pltpu

# ---------------- configuration (small, deterministic) ----------------
B, C_IN, H, W = 2, 4, 16, 16        # input  [B, C_IN, H, W]
C_OUT = 32                          # ASPP out_channels
RATES = (2, 4)                      # atrous rates
NB = 2 + len(RATES)                 # 1x1 branch + dilated branches + pooling branch
HW = H * W
M = B * HW
EPS = 1e-5


def _fold_bn(gamma, beta, mean, var):
    scale = gamma / jnp.sqrt(var + EPS)
    shift = beta - mean * scale
    return scale, shift


# ---------------- Pallas kernel: block-diag branch GEMM + projection ----------------
def _make_aspp_kernel(batch, hw):
    def kernel(xs_ref, wbd_ref, wproj_ref, o_ref):
        # One block-diagonal GEMM (bf16 operands, f32 accumulate) produces the
        # concatenated [NB*C_OUT + 1, batch*hw] branch slab directly; folded-BN
        # scale+shift are already baked into wbd, so only ReLU remains here.
        cat = jnp.dot(wbd_ref[...], xs_ref[...],
                      preferred_element_type=jnp.float32)
        cat = jnp.maximum(cat, 0.0)          # last row is exactly 1 (bias carrier)

        # 1x1 projection GEMM (f32): last wproj column is the folded-BN bias,
        # multiplied by the always-1 row of `cat`.  Dropout: inference identity.
        proj = jnp.dot(wproj_ref[...], cat, preferred_element_type=jnp.float32)
        proj = jnp.maximum(proj, 0.0)

        # Store directly in (B, C_OUT, HW) layout: static, lane-aligned slices
        # (hw = 256 is a multiple of 128 -> unmasked stores), no XLA transpose.
        for bb in range(batch):
            o_ref[bb] = proj[:, bb * hw:(bb + 1) * hw]
    return kernel


# ---------------- wrapper: layout plumbing + weight folding ----------------
def aspp_forward(x, params):
    x = x.astype(jnp.float32)
    b, c_in, h, w = x.shape
    hw = h * w
    m = b * hw

    # ---- stacked branch operand [k_total + 1, m]; column = bb*HW + y*W + xx
    rows = []
    # 1x1 branch rows (c_in)
    rows.append(jnp.transpose(x, (1, 0, 2, 3)).reshape(c_in, m))
    # dilated 3x3 branches: im2col rows (c_in*9 each), row = ci*9 + ky*3 + kx
    for r in RATES:
        xpad = jnp.pad(x, ((0, 0), (0, 0), (r, r), (r, r)))
        patches = [xpad[:, :, dy * r:dy * r + h, dx * r:dx * r + w]
                   for dy in range(3) for dx in range(3)]          # each [B, C, H, W]
        pc = jnp.stack(patches, axis=0)                            # [9, B, C, H, W]
        rows.append(jnp.transpose(pc, (2, 0, 1, 3, 4)).reshape(c_in * 9, m))
    # pooling branch rows (c_in): AdaptiveAvgPool2d(1) + bilinear upsample of a
    # 1x1 map == constant broadcast of the pooled features to every column.
    pooled = jnp.mean(x, axis=(2, 3))                              # [B, C_IN]
    rows.append(jnp.broadcast_to(pooled.T[:, :, None], (c_in, b, hw)).reshape(c_in, m))
    # constant-1 row: carries the folded-BN shifts through the same GEMM
    rows.append(jnp.ones((1, m), jnp.float32))
    xs = jnp.concatenate(rows, axis=0).astype(jnp.bfloat16)        # [81, m]

    # ---- block-diagonal branch weight [NB*C_OUT + 1, k_total + 1]
    k_sizes = [c_in] + [c_in * 9] * len(RATES) + [c_in]
    k_total = sum(k_sizes)                                         # 80
    n_cat = NB * C_OUT                                             # 128
    branch_w = ([params["w1"].reshape(C_OUT, c_in)]
                + [w3.reshape(C_OUT, c_in * 9) for w3 in params["w3"]]
                + [params["wpool"].reshape(C_OUT, c_in)])

    wbd = jnp.zeros((n_cat + 1, k_total + 1), jnp.float32)
    col = 0
    for i, (wi, ks) in enumerate(zip(branch_w, k_sizes)):
        scale, shift = _fold_bn(*params["bn_branches"][i])
        wbd = wbd.at[i * C_OUT:(i + 1) * C_OUT, col:col + ks].set(wi * scale[:, None])
        wbd = wbd.at[i * C_OUT:(i + 1) * C_OUT, k_total].set(shift)
        col += ks
    wbd = wbd.at[n_cat, k_total].set(1.0)          # always-1 pass-through row
    wbd = wbd.astype(jnp.bfloat16)

    # ---- projection weight with folded-BN scale + bias column (kept f32)
    sproj, bproj = _fold_bn(*params["bn_proj"])
    wproj = params["wproj"].reshape(C_OUT, n_cat) * sproj[:, None]
    wproj_ext = jnp.concatenate([wproj, bproj[:, None]], axis=1)   # [C_OUT, 129]

    kernel = _make_aspp_kernel(b, hw)
    vmem = pl.BlockSpec(memory_space=pltpu.MemorySpace.VMEM)

    out = pl.pallas_call(
        kernel,
        out_shape=jax.ShapeDtypeStruct((b, C_OUT, hw), jnp.float32),
        in_specs=[vmem, vmem, vmem],
        out_specs=vmem,
        # Gridless: single invocation (fastest on v5e/v6e; on v7x a
        # CORE_PARALLEL split over batch could be benchmarked but the fixed
        # per-step overhead likely outweighs it at this problem size).
    )(xs, wbd, wproj_ext)

    return out.reshape(b, C_OUT, h, w)                             # NCHW (free reshape)


# ---------------- pure-JAX reference (for a correctness check) ----------------
def _conv2d(x, w, padding, dilation):
    return lax.conv_general_dilated(
        x, w, window_strides=(1, 1),
        padding=((padding, padding), (padding, padding)),
        rhs_dilation=(dilation, dilation),
        dimension_numbers=("NCHW", "OIHW", "NCHW"),
        precision=lax.Precision.HIGHEST)


def aspp_reference(x, params):
    def bn_relu(y, bn):
        g, bt, mu, var = bn
        s = g / jnp.sqrt(var + EPS)
        return jnp.maximum(y * s[None, :, None, None]
                           + (bt - mu * s)[None, :, None, None], 0.0)

    res = [bn_relu(_conv2d(x, params["w1"], 0, 1), params["bn_branches"][0])]
    for i, r in enumerate(RATES):
        res.append(bn_relu(_conv2d(x, params["w3"][i], r, r), params["bn_branches"][1 + i]))
    pooled = jnp.mean(x, axis=(2, 3), keepdims=True)
    pb = bn_relu(_conv2d(pooled, params["wpool"], 0, 1), params["bn_branches"][NB - 1])
    res.append(jnp.broadcast_to(pb, (x.shape[0], C_OUT, x.shape[2], x.shape[3])))
    cat = jnp.concatenate(res, axis=1)
    return bn_relu(_conv2d(cat, params["wproj"], 0, 1), params["bn_proj"])


if __name__ == "__main__":
    key = jax.random.PRNGKey(0)
    ks = list(jax.random.split(key, 16))
    it = iter(ks)

    def bn_params(k, ch):
        k1, k2, k3, k4 = jax.random.split(k, 4)
        return (1.0 + 0.1 * jax.random.normal(k1, (ch,), jnp.float32),
                0.1 * jax.random.normal(k2, (ch,), jnp.float32),
                0.1 * jax.random.normal(k3, (ch,), jnp.float32),
                1.0 + 0.1 * jnp.abs(jax.random.normal(k4, (ch,), jnp.float32)))

    params = {
        "w1":    0.1 * jax.random.normal(next(it), (C_OUT, C_IN, 1, 1), jnp.float32),
        "w3":    [0.1 * jax.random.normal(next(it), (C_OUT, C_IN, 3, 3), jnp.float32)
                  for _ in RATES],
        "wpool": 0.1 * jax.random.normal(next(it), (C_OUT, C_IN, 1, 1), jnp.float32),
        "wproj": 0.1 * jax.random.normal(next(it), (C_OUT, NB * C_OUT, 1, 1), jnp.float32),
        "bn_branches": [bn_params(next(it), C_OUT) for _ in range(NB)],
        "bn_proj": bn_params(next(it), C_OUT),
    }
    x = jax.random.normal(next(it), (B, C_IN, H, W), jnp.float32)

    out = jax.jit(aspp_forward)(x, params)
    jax.block_until_ready(out)
    assert out.shape == (B, C_OUT, H, W)
    assert bool(jnp.all(jnp.isfinite(out)))

    # Tolerance accounts for bf16 branch-GEMM operands (f32 accumulation);
    # structural bugs would produce O(0.1..1) errors, far above this.
    ref = aspp_reference(x, params)
    assert bool(jnp.allclose(out, ref, atol=1e-2, rtol=1e-2))
    print("KERNEL_OK")
</pallas_src>

<mosaic_0001>
module attributes {stable_mosaic.version = 11 : i64} {
  func.func @kernel(%arg0: memref<81x512xbf16, #tpu.memory_space<vmem>>, %arg1: memref<129x81xbf16, #tpu.memory_space<vmem>>, %arg2: memref<32x129xf32, #tpu.memory_space<vmem>>, %arg3: memref<2x32x256xf32, #tpu.memory_space<vmem>>) attributes {dimension_semantics = [], scalar_prefetch = 0 : i64, scratch_operands = 0 : i64, tpu.core_type = #tpu.core_type<tc>} {
    %c0 = arith.constant 0 : index
    %c0_0 = arith.constant 0 : index
    %0 = vector.load %arg1[%c0, %c0_0] : memref<129x81xbf16, #tpu.memory_space<vmem>>, vector<129x81xbf16>
    %c0_1 = arith.constant 0 : index
    %c0_2 = arith.constant 0 : index
    %1 = vector.load %arg0[%c0_1, %c0_2] : memref<81x512xbf16, #tpu.memory_space<vmem>>, vector<81x512xbf16>
    %cst = arith.constant dense<0.000000e+00> : vector<129x512xf32>
    %2 = tpu.matmul %0, %1, %cst {dimension_numbers = #tpu.dot_dimension_numbers<[1], [0], [0], [1], [0, 0, 1, 1], [], []>} : vector<129x81xbf16>, vector<81x512xbf16>, vector<129x512xf32> -> vector<129x512xf32>
    %cst_3 = arith.constant 0.000000e+00 : f32
    %3 = vector.broadcast %cst_3 : f32 to vector<129x512xf32>
    %4 = arith.maximumf %2, %3 : vector<129x512xf32>
    %c0_4 = arith.constant 0 : index
    %c0_5 = arith.constant 0 : index
    %5 = vector.load %arg2[%c0_4, %c0_5] : memref<32x129xf32, #tpu.memory_space<vmem>>, vector<32x129xf32>
    %cst_6 = arith.constant dense<0.000000e+00> : vector<32x512xf32>
    %6 = tpu.matmul %5, %4, %cst_6 {dimension_numbers = #tpu.dot_dimension_numbers<[1], [0], [0], [1], [0, 0, 1, 1], [], []>} : vector<32x129xf32>, vector<129x512xf32>, vector<32x512xf32> -> vector<32x512xf32>
    %cst_7 = arith.constant 0.000000e+00 : f32
    %7 = vector.broadcast %cst_7 : f32 to vector<32x512xf32>
    %8 = arith.maximumf %6, %7 : vector<32x512xf32>
    %9 = vector.extract_strided_slice %8 {offsets = [0, 0], sizes = [32, 256], strides = [1, 1]} : vector<32x512xf32> to vector<32x256xf32>
    %c0_8 = arith.constant 0 : index
    %c0_9 = arith.constant 0 : index
    %c0_10 = arith.constant 0 : index
    %10 = vector.load %arg3[%c0_8, %c0_9, %c0_10] : memref<2x32x256xf32, #tpu.memory_space<vmem>>, vector<1x32x256xf32>
    %11 = vector.shape_cast %10 : vector<1x32x256xf32> to vector<32x256xf32>
    %12 = vector.shape_cast %9 : vector<32x256xf32> to vector<1x32x256xf32>
    tpu.vector_store %arg3[%c0_8, %c0_9, %c0_10], %12 {strides = array<i32>} : memref<2x32x256xf32, #tpu.memory_space<vmem>>, vector<1x32x256xf32>,
    %13 = vector.extract_strided_slice %8 {offsets = [0, 256], sizes = [32, 256], strides = [1, 1]} : vector<32x512xf32> to vector<32x256xf32>
    %c1 = arith.constant 1 : index
    %c0_11 = arith.constant 0 : index
    %c0_12 = arith.constant 0 : index
    %14 = vector.load %arg3[%c1, %c0_11, %c0_12] : memref<2x32x256xf32, #tpu.memory_space<vmem>>, vector<1x32x256xf32>
    %15 = vector.shape_cast %14 : vector<1x32x256xf32> to vector<32x256xf32>
    %16 = vector.shape_cast %13 : vector<32x256xf32> to vector<1x32x256xf32>
    tpu.vector_store %arg3[%c1, %c0_11, %c0_12], %16 {strides = array<i32>} : memref<2x32x256xf32, #tpu.memory_space<vmem>>, vector<1x32x256xf32>,
    return
  }
}

</mosaic_0001>

<bundles_post_ra>
// kernel: aspp_forward.1
= control target key start
LH: loop header
LB: loop body
LE: loop exit
PB: predicated region body
PF: predicated region fallthrough
CT: control target
= control target key end

     0   :  { %vm235_vm0 = vcmask 1040384   ;;  %v923_v1 = vmov 0   ;;  %vm207_vm1 = vcmask 662528   ;;  %vm568_vm2 = vcmask 7168   ;;  %s1315_s0 = inlined_call_operand.vmem [shape: bf16[81,512], index: 0, kind: input, shape index: {}]   ;;  %s1316_s1 = inlined_call_operand.vmem [shape: bf16[129,81], index: 1, kind: input, shape index: {}]   ;;  %s1317_s2 = inlined_call_operand.vmem [shape: f32[32,129], index: 2, kind: input, shape index: {}]   ;;  %s1318_s3 = inlined_call_operand.vmem [shape: f32[2,32,256], index: 3, kind: output, shape index: {}]  }
   0x1   :  { %v52_v0 = vld [vmem:[%s1315_s0 + $0xa0] sm:$0x11]  ;;  %v237_v2 = vsel %vm235_vm0, 65535, %v923_v1  ;;  %v53_v3 = vld [vmem:[%s1315_s0 + $0xa8] sm:$0x11]  ;;  %282 = vmatprep.mubr.bf16.mxu0 %v923_v1  ;;  %403 = vmatprep.mubr.bf16.mxu1 %v923_v1  ;;  %v916_v34 = vld [vmem:[%s1316_s1 + $0x10] sm:$0xff]  }
   0x2   :  { %v838_v4 = vcombine.high %v52_v0, %v52_v0  ;;  %v840_v5 = vcombine.high %v53_v3, %v53_v3  ;;  %v837_v6 = vcombine.low %v52_v0, %v52_v0  ;;  %v839_v7 = vcombine.low %v53_v3, %v53_v3  ;;  %v884_v8 = vld [vmem:[%s1315_s0 + $0x84] ss:$16 sps:$4 sm:$0xff]   ;;  %v886_v13 = vld [vmem:[%s1315_s0 + $0x8c] ss:$16 sps:$4 sm:$0xff]   ;;  %v888_v14 = vld [vmem:[%s1315_s0 + $0x80] ss:$16 sps:$4 sm:$0xff]  }
   0x3   :  { %v889_v15 = vld [vmem:[%s1315_s0 + $0x88] ss:$16 sps:$4 sm:$0xff]   ;;  %v890_v16 = vld [vmem:[%s1315_s0 + $0x64] ss:$16 sps:$4 sm:$0xff]   ;;  %v892_v17 = vld [vmem:[%s1315_s0 + $0x6c] ss:$16 sps:$4 sm:$0xff]  }
   0x4   :  { %v242_v9 = vand.u32 %v838_v4, %v237_v2  ;;  %v248_v10 = vand.u32 %v840_v5, %v237_v2  ;;  %v239_v11 = vand.u32 %v837_v6, %v237_v2  ;;  %v245_v12 = vand.u32 %v839_v7, %v237_v2  ;;  %v894_v18 = vld [vmem:[%s1315_s0 + $0x60] ss:$16 sps:$4 sm:$0xff]   ;;  %v895_v19 = vld [vmem:[%s1315_s0 + $0x68] ss:$16 sps:$4 sm:$0xff]   ;;  %v896_v20 = vld [vmem:[%s1315_s0 + $0x44] ss:$16 sps:$4 sm:$0xff]  }
   0x5   :  { %v898_v21 = vld [vmem:[%s1315_s0 + $0x4c] ss:$16 sps:$4 sm:$0xff]   ;;  %v900_v22 = vld [vmem:[%s1315_s0 + $0x40] ss:$16 sps:$4 sm:$0xff]   ;;  %v901_v23 = vld [vmem:[%s1315_s0 + $0x48] ss:$16 sps:$4 sm:$0xff]  }
   0x6   :  { %254 = vmatprep.subr.bf16.mxu0 %v242_v9  ;;  %375 = vmatprep.subr.bf16.mxu1 %v248_v10  ;;  %v902_v24 = vld [vmem:[%s1315_s0 + $0x24] ss:$16 sps:$4 sm:$0xff]   ;;  %v904_v25 = vld [vmem:[%s1315_s0 + $0x2c] ss:$16 sps:$4 sm:$0xff]   ;;  %v906_v26 = vld [vmem:[%s1315_s0 + $0x20] ss:$16 sps:$4 sm:$0xff]  }
   0x7   :  { %255 = vmatpush1.bf16.msra.mxu0 %v239_v11  ;;  %376 = vmatpush1.bf16.msra.mxu1 %v245_v12  ;;  %v907_v27 = vld [vmem:[%s1315_s0 + $0x28] ss:$16 sps:$4 sm:$0xff]   ;;  %v908_v28 = vld [vmem:[%s1315_s0 + $0x4] ss:$16 sps:$4 sm:$0xff]   ;;  %v910_v29 = vld [vmem:[%s1315_s0 + $0xc] ss:$16 sps:$4 sm:$0xff]  }
   0x8   :  { %256 = vmatprep.subr.bf16.mxu0 %v884_v8  ;;  %377 = vmatprep.subr.bf16.mxu1 %v886_v13  ;;  %v912_v30 = vld [vmem:[%s1315_s0] ss:$16 sps:$4 sm:$0xff]   ;;  %v913_v31 = vld [vmem:[%s1315_s0 + $0x8] ss:$16 sps:$4 sm:$0xff]  }
   0x9   :  { %v914_v32 = vld [vmem:[%s1316_s1] sm:$0xff]   ;;  %v915_v33 = vld [vmem:[%s1316_s1 + $0x8] sm:$0xff]   ;;  %v917_v35 = vld [vmem:[%s1316_s1 + $0x18] sm:$0xff]  }
   0xa   :  { %v918_v36 = vld [vmem:[%s1316_s1 + $0x20] sm:$0xff]   ;;  %v919_v37 = vld [vmem:[%s1316_s1 + $0x28] sm:$0xff]   ;;  %v920_v38 = vld [vmem:[%s1316_s1 + $0x30] sm:$0xff]  }
   0xb   :  { %257 = vmatpush1.bf16.msra.mxu0 %v888_v14  ;;  %378 = vmatpush1.bf16.msra.mxu1 %v889_v15  ;;  %v921_v39 = vld [vmem:[%s1316_s1 + $0x38] sm:$0xff]   ;;  %v922_v40 = vld [vmem:[%s1316_s1 + $0x40] ss:$0 sps:$4 sm:$0x11]   ;;  %v561_v41 = vld [vmem:[%s1317_s2 + $0x8] sm:$0xff] }
   0xc   :  { %258 = vmatprep.subr.bf16.mxu0 %v890_v16  ;;  %379 = vmatprep.subr.bf16.mxu1 %v892_v17 }
   0xf   :  { %259 = vmatpush1.bf16.msra.mxu0 %v894_v18  ;;  %380 = vmatpush1.bf16.msra.mxu1 %v895_v19 }
  0x10   :  { %260 = vmatprep.subr.bf16.mxu0 %v896_v20  ;;  %381 = vmatprep.subr.bf16.mxu1 %v898_v21 }
  0x13   :  { %261 = vmatpush1.bf16.msra.mxu0 %v900_v22  ;;  %382 = vmatpush1.bf16.msra.mxu1 %v901_v23 }
  0x14   :  { %262 = vmatprep.subr.bf16.mxu0 %v902_v24  ;;  %383 = vmatprep.subr.bf16.mxu1 %v904_v25 }
  0x17   :  { %263 = vmatpush1.bf16.msra.mxu0 %v906_v26  ;;  %384 = vmatpush1.bf16.msra.mxu1 %v907_v27 }
  0x18   :  { %264 = vmatprep.subr.bf16.mxu0 %v908_v28  ;;  %385 = vmatprep.subr.bf16.mxu1 %v910_v29 }
  0x1b   :  { %265 = vmatpush1.bf16.msra.mxu0 %v912_v30  ;;  %386 = vmatpush1.bf16.msra.mxu1 %v913_v31 }
  0x1e   :  { %841 = vmatmul.mubr.msk.bf16.vlgmr.msra.gmra.mxu0 %vm207_vm1, %v914_v32  ;;  %850 = vmatmul.mubr.msk.bf16.vlgmr.msra.gmra.mxu1 %vm207_vm1, %v914_v32 }
  0x1f   :  { %292 = vmatprep.mubr.bf16.mxu0 %v923_v1  ;;  %413 = vmatprep.mubr.bf16.mxu1 %v923_v1 }
  0x26   :  { %842 = vmatmul.mubr.msk.bf16.gmra.mxu0 %vm207_vm1, %v915_v33  ;;  %851 = vmatmul.mubr.msk.bf16.gmra.mxu1 %vm207_vm1, %v915_v33 }
  0x27   :  { %302 = vmatprep.mubr.bf16.mxu0 %v923_v1  ;;  %423 = vmatprep.mubr.bf16.mxu1 %v923_v1 }
  0x2e   :  { %843 = vmatmul.mubr.msk.bf16.gmra.mxu0 %vm207_vm1, %v916_v34  ;;  %852 = vmatmul.mubr.msk.bf16.gmra.mxu1 %vm207_vm1, %v916_v34 }
  0x2f   :  { %312 = vmatprep.mubr.bf16.mxu0 %v923_v1  ;;  %433 = vmatprep.mubr.bf16.mxu1 %v923_v1 }
  0x36   :  { %844 = vmatmul.mubr.msk.bf16.gmra.mxu0 %vm207_vm1, %v917_v35  ;;  %853 = vmatmul.mubr.msk.bf16.gmra.mxu1 %vm207_vm1, %v917_v35 }
  0x37   :  { %322 = vmatprep.mubr.bf16.mxu0 %v923_v1  ;;  %443 = vmatprep.mubr.bf16.mxu1 %v923_v1 }
  0x3e   :  { %845 = vmatmul.mubr.msk.bf16.gmra.mxu0 %vm207_vm1, %v918_v36  ;;  %854 = vmatmul.mubr.msk.bf16.gmra.mxu1 %vm207_vm1, %v918_v36 }
  0x3f   :  { %332 = vmatprep.mubr.bf16.mxu0 %v923_v1  ;;  %453 = vmatprep.mubr.bf16.mxu1 %v923_v1 }
  0x46   :  { %846 = vmatmul.mubr.msk.bf16.gmra.mxu0 %vm207_vm1, %v919_v37  ;;  %855 = vmatmul.mubr.msk.bf16.gmra.mxu1 %vm207_vm1, %v919_v37 }
  0x47   :  { %342 = vmatprep.mubr.bf16.mxu0 %v923_v1  ;;  %463 = vmatprep.mubr.bf16.mxu1 %v923_v1 }
  0x4e   :  { %847 = vmatmul.mubr.msk.bf16.gmra.mxu0 %vm207_vm1, %v920_v38  ;;  %856 = vmatmul.mubr.msk.bf16.gmra.mxu1 %vm207_vm1, %v920_v38 }
  0x4f   :  { %352 = vmatprep.mubr.bf16.mxu0 %v923_v1  ;;  %473 = vmatprep.mubr.bf16.mxu1 %v923_v1 }
  0x56   :  { %848 = vmatmul.mubr.msk.bf16.gmra.mxu0 %vm207_vm1, %v921_v39  ;;  %857 = vmatmul.mubr.msk.bf16.gmra.mxu1 %vm207_vm1, %v921_v39 }
  0x57   :  { %362 = vmatprep.mubr.bf16.mxu0 %v923_v1  ;;  %483 = vmatprep.mubr.bf16.mxu1 %v923_v1 }
  0x5e   :  { %849 = vmatmul.mubr.msk.bf16.gmra.mxu0 %vm207_vm1, %v922_v40  ;;  %858 = vmatmul.mubr.msk.bf16.gmra.mxu1 %vm207_vm1, %v922_v40 }
  0x5f   :  { %861 = vmatprep.mubr.msk.f32.mxu0 %vm568_vm2, %v561_v41  ;;  %867 = vmatprep.mubr.msk.f32.mxu1 %vm568_vm2, %v561_v41 }
  0xde   :  { %v1080_v42 = vpop.f32.mrf.mxu0  ;;  %v1082_v43 = vpop.f32.mrf.mxu1 }
  0xdf   :  { %1319 = vst [vmem:[#allocation2_spill] sm:$0xff] %v1080_v42  ;;  %1320 = vst [vmem:[#allocation3_spill] sm:$0xff] %v1082_v43 }
  0xe0   :  { %v1084_v44 = vpop.f32.mrf.mxu0  ;;  %v1086_v45 = vpop.f32.mrf.mxu1 }
  0xe1   :  { %1321 = vst [vmem:[#allocation4_spill] sm:$0xff] %v1084_v44  ;;  %1322 = vst [vmem:[#allocation5_spill] sm:$0xff] %v1086_v45 }
  0xe2   :  { %v1088_v46 = vpop.f32.mrf.mxu0  ;;  %v1090_v47 = vpop.f32.mrf.mxu1 }
  0xe3   :  { %1323 = vst [vmem:[#allocation6_spill] sm:$0xff] %v1088_v46  ;;  %1324 = vst [vmem:[#allocation7_spill] sm:$0xff] %v1090_v47 }
  0xe4   :  { %v1092_v48 = vpop.f32.mrf.mxu0  ;;  %v1094_v49 = vpop.f32.mrf.mxu1 }
  0xe5   :  { %1325 = vst [vmem:[#allocation8_spill] sm:$0xff] %v1092_v48  ;;  %1326 = vst [vmem:[#allocation9_spill] sm:$0xff] %v1094_v49 }
  0xe6   :  { %v1096_v50 = vpop.f32.mrf.mxu0  ;;  %v1098_v51 = vpop.f32.mrf.mxu1 }
  0xe7   :  { %1327 = vst [vmem:[#allocation10_spill] sm:$0xff] %v1096_v50  ;;  %1328 = vst [vmem:[#allocation11_spill] sm:$0xff] %v1098_v51 }
  0xe8   :  { %v1100_v52 = vpop.f32.mrf.mxu0  ;;  %v1102_v53 = vpop.f32.mrf.mxu1 }
  0xe9   :  { %1329 = vst [vmem:[#allocation12_spill] sm:$0xff] %v1100_v52  ;;  %1330 = vst [vmem:[#allocation13_spill] sm:$0xff] %v1102_v53 }
  0xea   :  { %v1104_v54 = vpop.f32.mrf.mxu0  ;;  %v1106_v55 = vpop.f32.mrf.mxu1 }
  0xec   :  { %v1108_v56 = vpop.f32.mrf.mxu0  ;;  %v1110_v57 = vpop.f32.mrf.mxu1 }
  0xee   :  { %v1112_v58 = vpop.f32.mrf.mxu0  ;;  %v1114_v59 = vpop.f32.mrf.mxu1 }
  0xf0   :  { %v1116_v60 = vpop.f32.mrf.mxu0  ;;  %v1118_v61 = vpop.f32.mrf.mxu1 }
  0xf2   :  { %v1120_v62 = vpop.f32.mrf.mxu0  ;;  %v1122_v63 = vpop.f32.mrf.mxu1 }
  0xf4   :  { %v1124_v0 = vpop.f32.mrf.mxu0  ;;  %v1126_v1 = vpop.f32.mrf.mxu1 }
  0xf6   :  { %v1128_v2 = vpop.f32.mrf.mxu0  ;;  %v1130_v3 = vpop.f32.mrf.mxu1 }
  0xf8   :  { %v1132_v4 = vpop.f32.mrf.mxu0  ;;  %v1134_v5 = vpop.f32.mrf.mxu1 }
  0xfa   :  { %v1136_v6 = vpop.f32.mrf.mxu0  ;;  %v1138_v7 = vpop.f32.mrf.mxu1 }
  0xfc   :  { %v1140_v8 = vpop.f32.mrf.mxu0  ;;  %v1142_v9 = vpop.f32.mrf.mxu1 }
  0xfe   :  { %v1144_v10 = vpop.f32.mrf.mxu0  ;;  %v1146_v11 = vpop.f32.mrf.mxu1 }
 0x100   :  { %v1148_v12 = vpop.f32.mrf.mxu0  ;;  %v1150_v13 = vpop.f32.mrf.mxu1 }
 0x102   :  { %v1152_v14 = vpop.f32.mrf.mxu0  ;;  %v1154_v15 = vpop.f32.mrf.mxu1 }
 0x104   :  { %v1156_v16 = vpop.f32.mrf.mxu0  ;;  %v1158_v17 = vpop.f32.mrf.mxu1 }
 0x106   :  { %v1160_v18 = vpop.f32.mrf.mxu0  ;;  %v1162_v19 = vpop.f32.mrf.mxu1 }
 0x108   :  { %v1164_v20 = vpop.f32.mrf.mxu0  ;;  %v1166_v21 = vpop.f32.mrf.mxu1 }
 0x10a   :  { %v1168_v22 = vpop.f32.mrf.mxu0  ;;  %v1170_v23 = vpop.f32.mrf.mxu1 }
 0x10c   :  { %v1172_v24 = vpop.f32.mrf.mxu0  ;;  %v1174_v25 = vpop.f32.mrf.mxu1 }
 0x10e   :  { %v344_v26 = vpop.f32.mrf.mxu0  ;;  %v465_v27 = vpop.f32.mrf.mxu1 }
 0x110   :  { %v346_v28 = vpop.f32.mrf.mxu0  ;;  %v467_v29 = vpop.f32.mrf.mxu1 }
 0x112   :  { %v348_v30 = vpop.f32.mrf.mxu0  ;;  %v469_v31 = vpop.f32.mrf.mxu1 }
 0x114   :  { %v350_v32 = vpop.f32.mrf.mxu0  ;;  %v471_v33 = vpop.f32.mrf.mxu1 }
 0x116   :  { %v354_v34 = vpop.f32.mrf.mxu0  ;;  %v475_v35 = vpop.f32.mrf.mxu1 }
 0x117   :  { %v548_v51 = vmax.f32 %v354_v34, 0.0  ;;  %v550_v50 = vmax.f32 %v475_v35, 0.0 }
 0x118   :  { %v356_v36 = vpop.f32.mrf.mxu0  ;;  %v477_v37 = vpop.f32.mrf.mxu1 }
 0x119   :  { %v549_v49 = vmax.f32 %v356_v36, 0.0  ;;  %v551_v48 = vmax.f32 %v477_v37, 0.0 }
 0x11a   :  { %v358_v38 = vpop.f32.mrf.mxu0  ;;  %v479_v39 = vpop.f32.mrf.mxu1 }
 0x11b   :  { %v552_v45 = vmax.f32 %v358_v38, 0.0  ;;  %v554_v44 = vmax.f32 %v479_v39, 0.0  ;;  %v544_v38 = vmax.f32 %v348_v30, 0.0  ;;  %v546_v39 = vmax.f32 %v469_v31, 0.0  ;;  %v1334_v31 = vld [vmem:[#allocation11_spill] sm:$0xff] }
 0x11c   :  { %v360_v40 = vpop.f32.mrf.mxu0  ;;  %v481_v41 = vpop.f32.mrf.mxu1 }
 0x11d   :  { %v553_v43 = vmax.f32 %v360_v40, 0.0  ;;  %v555_v42 = vmax.f32 %v481_v41, 0.0  ;;  %v545_v40 = vmax.f32 %v350_v32, 0.0  ;;  %v547_v41 = vmax.f32 %v471_v33, 0.0 }
 0x11e   :  { %v1176_v47 = vpop.f32.mrf.mxu0  ;;  %v1178_v46 = vpop.f32.mrf.mxu1  ;;  %v537_v32 = vmax.f32 %v1172_v24, 0.0  ;;  %v534_v24 = vmax.f32 %v1162_v19, 0.0  ;;  %v524_v19 = vmax.f32 %v1144_v10, 0.0  ;;  %v519_v10 = vmax.f32 %v1134_v5, 0.0 }
 0x11f   :  { %593 = vmatprep.subr.mxu0 %v553_v43  ;;  %682 = vmatprep.subr.mxu1 %v555_v42  ;;  %v541_v43 = vmax.f32 %v346_v28, 0.0  ;;  %v543_v42 = vmax.f32 %v467_v29, 0.0  ;;  %v509_v5 = vmax.f32 %v1116_v60, 0.0  ;;  %v506_v60 = vmax.f32 %v1106_v55, 0.0  ;;  %v1332_v29 = vld [vmem:[#allocation13_spill] sm:$0xff]  ;;  %v1337_v55 = vld [vmem:[#allocation6_spill] sm:$0xff] }
 0x120   :  { %594 = vmatpush1.msra.mxu0 %v552_v45  ;;  %683 = vmatpush1.msra.mxu1 %v554_v44  ;;  %v1180_v53 = vpop.f32.mrf.mxu0  ;;  %v1182_v52 = vpop.f32.mrf.mxu1  ;;  %v540_v45 = vmax.f32 %v344_v26, 0.0  ;;  %v542_v44 = vmax.f32 %v465_v27, 0.0  ;;  %v535_v26 = vmax.f32 %v1166_v21, 0.0  ;;  %v532_v27 = vmax.f32 %v1160_v18, 0.0 }
 0x121   :  { %595 = vmatprep.subr.mxu0 %v549_v49  ;;  %684 = vmatprep.subr.mxu1 %v551_v48  ;;  %v539_v48 = vmax.f32 %v1174_v25, 0.0  ;;  %v536_v49 = vmax.f32 %v1168_v22, 0.0  ;;  %v529_v25 = vmax.f32 %v1156_v16, 0.0  ;;  %v531_v22 = vmax.f32 %v1158_v17, 0.0 }
 0x122   :  { %596 = vmatpush1.msra.mxu0 %v548_v51  ;;  %685 = vmatpush1.msra.mxu1 %v550_v50  ;;  %v368_v36 = vpop.f32.mrf.mxu0  ;;  %v489_v37 = vpop.f32.mrf.mxu1  ;;  %v538_v50 = vmax.f32 %v1170_v23, 0.0  ;;  %v533_v51 = vmax.f32 %v1164_v20, 0.0  ;;  %v528_v23 = vmax.f32 %v1152_v14, 0.0  ;;  %v530_v20 = vmax.f32 %v1154_v15, 0.0 }
 0x123   :  { %597 = vmatprep.subr.mxu0 %v545_v40  ;;  %686 = vmatprep.subr.mxu1 %v547_v41  ;;  %v525_v21 = vmax.f32 %v1148_v12, 0.0  ;;  %v527_v18 = vmax.f32 %v1150_v13, 0.0  ;;  %v526_v16 = vmax.f32 %v1146_v11, 0.0  ;;  %v521_v17 = vmax.f32 %v1140_v8, 0.0  ;;  %v1336_v40 = vld [vmem:[#allocation9_spill] sm:$0xff]  ;;  %v1339_v36 = vld [vmem:[#allocation4_spill] sm:$0xff] }
 0x124   :  { %598 = vmatpush1.msra.mxu0 %v544_v38  ;;  %687 = vmatpush1.msra.mxu1 %v546_v39  ;;  %v369_v34 = vpop.f32.mrf.mxu0  ;;  %v490_v35 = vpop.f32.mrf.mxu1  ;;  %v523_v14 = vmax.f32 %v1142_v9, 0.0  ;;  %v520_v15 = vmax.f32 %v1136_v6, 0.0  ;;  %v522_v12 = vmax.f32 %v1138_v7, 0.0  ;;  %v517_v13 = vmax.f32 %v1132_v4, 0.0  ;;  %v1338_v38 = vld [vmem:[#allocation7_spill] sm:$0xff] }
 0x125   :  { %599 = vmatprep.subr.mxu0 %v541_v43  ;;  %688 = vmatprep.subr.mxu1 %v543_v42  ;;  %v516_v11 = vmax.f32 %v1128_v2, 0.0  ;;  %v518_v8 = vmax.f32 %v1130_v3, 0.0  ;;  %v513_v9 = vmax.f32 %v1124_v0, 0.0  ;;  %v515_v6 = vmax.f32 %v1126_v1, 0.0  ;;  %v1340_v43 = vld [vmem:[#allocation5_spill] sm:$0xff]  ;;  %v1342_v34 = vld [vmem:[#allocation3_spill] sm:$0xff] }
 0x126   :  { %600 = vmatpush1.msra.mxu0 %v540_v45  ;;  %689 = vmatpush1.msra.mxu1 %v542_v44  ;;  %v512_v7 = vmax.f32 %v1120_v62, 0.0  ;;  %v514_v4 = vmax.f32 %v1122_v63, 0.0  ;;  %v511_v2 = vmax.f32 %v1118_v61, 0.0  ;;  %v508_v3 = vmax.f32 %v1112_v58, 0.0  ;;  %v1331_v61 = vld [vmem:[#allocation12_spill] sm:$0xff]  ;;  %v1341_v45 = vld [vmem:[#allocation2_spill] sm:$0xff] }
 0x127   :  { %601 = vmatprep.subr.mxu0 %v537_v32  ;;  %690 = vmatprep.subr.mxu1 %v539_v48  ;;  %v510_v0 = vmax.f32 %v1114_v59, 0.0  ;;  %v505_v1 = vmax.f32 %v1108_v56, 0.0  ;;  %v507_v62 = vmax.f32 %v1110_v57, 0.0  ;;  %v504_v63 = vmax.f32 %v1104_v54, 0.0  ;;  %v1333_v59 = vld [vmem:[#allocation10_spill] sm:$0xff]  ;;  %v1335_v57 = vld [vmem:[#allocation8_spill] sm:$0xff] }
 0x128   :  { %602 = vmatpush1.msra.mxu0 %v536_v49  ;;  %691 = vmatpush1.msra.mxu1 %v538_v50  ;;  %v501_v28 = vmax.f32 %v1331_v61, 0.0  ;;  %v503_v58 = vmax.f32 %v1332_v29, 0.0  ;;  %v500_v30 = vmax.f32 %v1333_v59, 0.0  ;;  %v502_v56 = vmax.f32 %v1334_v31, 0.0 }
 0x129   :  { %603 = vmatprep.subr.mxu0 %v533_v51  ;;  %692 = vmatprep.subr.mxu1 %v535_v26  ;;  %v497_v33 = vmax.f32 %v1335_v57, 0.0  ;;  %v499_v54 = vmax.f32 %v1336_v40, 0.0  ;;  %v496_v41 = vmax.f32 %v1337_v55, 0.0  ;;  %v498_v39 = vmax.f32 %v1338_v38, 0.0  ;;  %v560_v51 = vld [vmem:[%s1317_s2] sm:$0xff]  ;;  %v567_v26 = vld [vmem:[%s1317_s2 + $0x38] sm:$0xff] }
 0x12a   :  { %604 = vmatpush1.msra.mxu0 %v532_v27  ;;  %693 = vmatpush1.msra.mxu1 %v534_v24  ;;  %v493_v37 = vmax.f32 %v1339_v36, 0.0  ;;  %v495_v42 = vmax.f32 %v1340_v43, 0.0  ;;  %v492_v44 = vmax.f32 %v1341_v45, 0.0  ;;  %v494_v35 = vmax.f32 %v1342_v34, 0.0  ;;  %v566_v27 = vld [vmem:[%s1317_s2 + $0x30] sm:$0xff] }
 0x12b   :  { %605 = vmatprep.subr.mxu0 %v529_v25  ;;  %694 = vmatprep.subr.mxu1 %v531_v22  ;;  %v557_v32 = vmax.f32 %v1180_v53, 0.0  ;;  %v559_v48 = vmax.f32 %v1182_v52, 0.0  ;;  %v556_v49 = vmax.f32 %v1176_v47, 0.0  ;;  %v558_v50 = vmax.f32 %v1178_v46, 0.0  ;;  %v563_v53 = vld [vmem:[%s1317_s2 + $0x18] sm:$0xff]  ;;  %v562_v46 = vld [vmem:[%s1317_s2 + $0x10] sm:$0xff] }
 0x12c   :  { %606 = vmatpush1.msra.mxu0 %v528_v23  ;;  %695 = vmatpush1.msra.mxu1 %v530_v20  ;;  %v565_v47 = vld [vmem:[%s1317_s2 + $0x28] sm:$0xff]  ;;  %v564_v52 = vld [vmem:[%s1317_s2 + $0x20] sm:$0xff] }
 0x12d   :  { %607 = vmatprep.subr.mxu0 %v525_v21  ;;  %696 = vmatprep.subr.mxu1 %v527_v18 }
 0x12e   :  { %608 = vmatpush1.msra.mxu0 %v524_v19  ;;  %697 = vmatpush1.msra.mxu1 %v526_v16 }
 0x12f   :  { %609 = vmatprep.subr.mxu0 %v521_v17  ;;  %698 = vmatprep.subr.mxu1 %v523_v14 }
 0x130   :  { %610 = vmatpush1.msra.mxu0 %v520_v15  ;;  %699 = vmatpush1.msra.mxu1 %v522_v12 }
 0x131   :  { %611 = vmatprep.subr.mxu0 %v517_v13  ;;  %700 = vmatprep.subr.mxu1 %v519_v10 }
 0x132   :  { %612 = vmatpush1.msra.mxu0 %v516_v11  ;;  %701 = vmatpush1.msra.mxu1 %v518_v8 }
 0x133   :  { %613 = vmatprep.subr.mxu0 %v513_v9  ;;  %702 = vmatprep.subr.mxu1 %v515_v6 }
 0x134   :  { %614 = vmatpush1.msra.mxu0 %v512_v7  ;;  %703 = vmatpush1.msra.mxu1 %v514_v4 }
 0x135   :  { %615 = vmatprep.subr.mxu0 %v509_v5  ;;  %704 = vmatprep.subr.mxu1 %v511_v2 }
 0x136   :  { %616 = vmatpush1.msra.mxu0 %v508_v3  ;;  %705 = vmatpush1.msra.mxu1 %v510_v0 }
 0x137   :  { %617 = vmatprep.subr.mxu0 %v505_v1  ;;  %706 = vmatprep.subr.mxu1 %v507_v62 }
 0x138   :  { %618 = vmatpush1.msra.mxu0 %v504_v63  ;;  %707 = vmatpush1.msra.mxu1 %v506_v60 }
 0x139   :  { %619 = vmatprep.subr.mxu0 %v501_v28  ;;  %708 = vmatprep.subr.mxu1 %v503_v58 }
 0x13a   :  { %620 = vmatpush1.msra.mxu0 %v500_v30  ;;  %709 = vmatpush1.msra.mxu1 %v502_v56 }
 0x13b   :  { %621 = vmatprep.subr.mxu0 %v497_v33  ;;  %710 = vmatprep.subr.mxu1 %v499_v54 }
 0x13c   :  { %622 = vmatpush1.msra.mxu0 %v496_v41  ;;  %711 = vmatpush1.msra.mxu1 %v498_v39 }
 0x13d   :  { %623 = vmatprep.subr.mxu0 %v493_v37  ;;  %712 = vmatprep.subr.mxu1 %v495_v42 }
 0x13e   :  { %624 = vmatpush1.msra.mxu0 %v492_v44  ;;  %713 = vmatpush1.msra.mxu1 %v494_v35 }
 0x13f   :  { %859 = vmatprep.subr.msk.mxu0 %vm235_vm0, %v557_v32  ;;  %865 = vmatprep.subr.msk.mxu1 %vm235_vm0, %v559_v48 }
 0x140   :  { %860 = vmatpush2.msk.msra.mxu0 %vm235_vm0, %v556_v49  ;;  %866 = vmatpush2.msk.msra.mxu1 %vm235_vm0, %v558_v50 }
 0x141   :  { %658 = vmatmul.mubr.f32.vlgmr.msra.gmra.mxu0 %v560_v51  ;;  %747 = vmatmul.mubr.f32.vlgmr.msra.gmra.mxu1 %v560_v51 }
 0x142   :  { %862 = vmatprep.mubr.msk.f32.mxu0 %vm568_vm2, %v563_v53  ;;  %868 = vmatprep.mubr.msk.f32.mxu1 %vm568_vm2, %v563_v53 }
 0x145   :  { %664 = vmatmul.mubr.f32.gmra.mxu0 %v562_v46  ;;  %753 = vmatmul.mubr.f32.gmra.mxu1 %v562_v46 }
 0x146   :  { %863 = vmatprep.mubr.msk.f32.mxu0 %vm568_vm2, %v565_v47  ;;  %869 = vmatprep.mubr.msk.f32.mxu1 %vm568_vm2, %v565_v47 }
 0x149   :  { %670 = vmatmul.mubr.f32.gmra.mxu0 %v564_v52  ;;  %759 = vmatmul.mubr.f32.gmra.mxu1 %v564_v52 }
 0x14a   :  { %864 = vmatprep.mubr.msk.f32.mxu0 %vm568_vm2, %v567_v26  ;;  %870 = vmatprep.mubr.msk.f32.mxu1 %vm568_vm2, %v567_v26 }
 0x14d   :  { %676 = vmatmul.mubr.f32.gmra.mxu0 %v566_v27  ;;  %765 = vmatmul.mubr.f32.gmra.mxu1 %v566_v27 }
 0x201   :  { %v659_v24 = vpop.f32.mrf.mxu0  ;;  %v748_v25 = vpop.f32.mrf.mxu1 }
 0x202   :  { %v771_v22 = vmax.f32 %v659_v24, 0.0  ;;  %v773_v23 = vmax.f32 %v748_v25, 0.0 }
 0x203   :  { %v661_v20 = vpop.f32.mrf.mxu0  ;;  %v750_v21 = vpop.f32.mrf.mxu1 }
 0x204   :  { %787 = vst [vmem:[%s1318_s3] sm:$0xff] %v771_v22  ;;  %871 = vst [vmem:[%s1318_s3 + $0x40] sm:$0xff] %v773_v23  ;;  %v772_v18 = vmax.f32 %v661_v20, 0.0  ;;  %v774_v19 = vmax.f32 %v750_v21, 0.0 }
 0x205   :  { %v665_v16 = vpop.f32.mrf.mxu0  ;;  %v754_v17 = vpop.f32.mrf.mxu1 }
 0x206   :  { %788 = vst [vmem:[%s1318_s3 + $0x8] sm:$0xff] %v772_v18  ;;  %872 = vst [vmem:[%s1318_s3 + $0x48] sm:$0xff] %v774_v19  ;;  %v775_v14 = vmax.f32 %v665_v16, 0.0  ;;  %v777_v15 = vmax.f32 %v754_v17, 0.0 }
 0x207   :  { %v667_v12 = vpop.f32.mrf.mxu0  ;;  %v756_v13 = vpop.f32.mrf.mxu1 }
 0x208   :  { %789 = vst [vmem:[%s1318_s3 + $0x10] sm:$0xff] %v775_v14  ;;  %873 = vst [vmem:[%s1318_s3 + $0x50] sm:$0xff] %v777_v15  ;;  %v776_v10 = vmax.f32 %v667_v12, 0.0  ;;  %v778_v11 = vmax.f32 %v756_v13, 0.0 }
 0x209   :  { %v671_v8 = vpop.f32.mrf.mxu0  ;;  %v760_v9 = vpop.f32.mrf.mxu1 }
 0x20a   :  { %790 = vst [vmem:[%s1318_s3 + $0x18] sm:$0xff] %v776_v10  ;;  %874 = vst [vmem:[%s1318_s3 + $0x58] sm:$0xff] %v778_v11  ;;  %v779_v6 = vmax.f32 %v671_v8, 0.0  ;;  %v781_v7 = vmax.f32 %v760_v9, 0.0 }
 0x20b   :  { %v673_v4 = vpop.f32.mrf.mxu0  ;;  %v762_v5 = vpop.f32.mrf.mxu1 }
 0x20c   :  { %791 = vst [vmem:[%s1318_s3 + $0x20] sm:$0xff] %v779_v6  ;;  %875 = vst [vmem:[%s1318_s3 + $0x60] sm:$0xff] %v781_v7  ;;  %v780_v2 = vmax.f32 %v673_v4, 0.0  ;;  %v782_v3 = vmax.f32 %v762_v5, 0.0 }
 0x20d   :  { %v677_v0 = vpop.f32.mrf.mxu0  ;;  %v766_v1 = vpop.f32.mrf.mxu1 }
 0x20e   :  { %792 = vst [vmem:[%s1318_s3 + $0x28] sm:$0xff] %v780_v2  ;;  %876 = vst [vmem:[%s1318_s3 + $0x68] sm:$0xff] %v782_v3  ;;  %v783_v62 = vmax.f32 %v677_v0, 0.0  ;;  %v785_v63 = vmax.f32 %v766_v1, 0.0 }
 0x20f   :  { %v679_v60 = vpop.f32.mrf.mxu0  ;;  %v768_v61 = vpop.f32.mrf.mxu1 }
 0x210   :  { %793 = vst [vmem:[%s1318_s3 + $0x30] sm:$0xff] %v783_v62  ;;  %877 = vst [vmem:[%s1318_s3 + $0x70] sm:$0xff] %v785_v63  ;;  %v784_v28 = vmax.f32 %v679_v60, 0.0  ;;  %v786_v29 = vmax.f32 %v768_v61, 0.0 }
 0x212   :  { %794 = vst [vmem:[%s1318_s3 + $0x38] sm:$0xff] %v784_v28  ;;  %878 = vst [vmem:[%s1318_s3 + $0x78] sm:$0xff] %v786_v29 }

</bundles_post_ra>
